<compile_context>
chip_gen: v6e
topology: v6e:2x2x1
jax: 0.10.0
libtpu: 0.0.40
codegen_flags: <defaults>
</compile_context>

<pallas_src>
import functools

import jax
import jax.numpy as jnp
from jax.experimental import pallas as pl
from jax.experimental.pallas import tpu as pltpu

_LANE = 128
_SUBLANE = 8
_MAX_TILE_ROWS = 256     # (256, 128) f32 = 128 KiB per input stream per block


def _ceil_div(a, b):
    return -(-a // b)


def _round_up(a, b):
    return _ceil_div(a, b) * b


def _obj_tiling(total):
    """(padded_rows, tile_rows, num_blocks) for a flat obj plane of `total` elems."""
    rows = _round_up(max(1, _ceil_div(total, _LANE)), _SUBLANE)
    num_blocks = _ceil_div(rows, _MAX_TILE_ROWS)
    tile_rows = _round_up(_ceil_div(rows, num_blocks), _SUBLANE)
    padded_rows = tile_rows * num_blocks
    return padded_rows, tile_rows, num_blocks


# -----------------------------------------------------------------------------
# Pallas kernel: numerically stable BCE-with-logits, reduced to an (8, 128)
# per-block partial (pure vreg-wise adds; no cross-sublane/XLU reduce, no
# masked stores).  Grid axis is "parallel" (v7x megacore); the final reduce
# over the tiny (num_blocks*8, 128) output is done in XLA.
# -----------------------------------------------------------------------------
def _bce_partial_kernel(x_ref, z_ref, out_ref):
    x = x_ref[...].astype(jnp.float32)          # (tile_rows, 128) logits
    z = z_ref[...].astype(jnp.float32)          # (tile_rows, 128) targets
    # identical to torch.nn.BCEWithLogitsLoss: max(x,0) - x*z + log1p(exp(-|x|))
    loss = jnp.maximum(x, 0.0) - x * z + jnp.log1p(jnp.exp(-jnp.abs(x)))
    tile_rows = loss.shape[0]                   # static, multiple of 8
    acc = loss[0:_SUBLANE, :]
    for r in range(_SUBLANE, tile_rows, _SUBLANE):
        acc = acc + loss[r:r + _SUBLANE, :]
    out_ref[...] = acc                          # (8, 128) partial


def obj_bce_sum(logits2d, targets2d, tile_rows, num_blocks):
    """sum(BCEWithLogits(logits2d, targets2d)) over a (padded_rows, 128) plane.

    Padding elements must carry logit == -100 / target == 0 so their BCE
    contribution (log1p(exp(-100)) ~ 4e-44, a denormal) is effectively zero.
    """
    n = logits2d.shape[0] * _LANE
    in_bytes = n * (jnp.dtype(logits2d.dtype).itemsize
                    + jnp.dtype(targets2d.dtype).itemsize)
    partials = pl.pallas_call(
        _bce_partial_kernel,
        out_shape=jax.ShapeDtypeStruct((num_blocks * _SUBLANE, _LANE),
                                       jnp.float32),
        grid=(num_blocks,),
        in_specs=[
            pl.BlockSpec((tile_rows, _LANE), lambda i: (i, 0)),
            pl.BlockSpec((tile_rows, _LANE), lambda i: (i, 0)),
        ],
        out_specs=pl.BlockSpec((_SUBLANE, _LANE), lambda i: (i, 0)),
        compiler_params=pltpu.CompilerParams(
            dimension_semantics=("parallel",)),
        cost_estimate=pl.CostEstimate(
            flops=9 * n,
            transcendentals=2 * n,
            bytes_accessed=in_bytes + num_blocks * _SUBLANE * _LANE * 4),
    )(logits2d, targets2d)
    return jnp.sum(partials)


# -----------------------------------------------------------------------------
# Glue: target building and IoU (small, data-dependent), done in plain JAX
# -----------------------------------------------------------------------------
def _bbox_iou_xywh(pxy, pwh, txy, twh, eps=1e-7):
    # matches YOLOLoss._bbox_iou with x1y1x2y2=False
    b1_x1 = pxy[:, 0] - pwh[:, 0] / 2
    b1_x2 = pxy[:, 0] + pwh[:, 0] / 2
    b1_y1 = pxy[:, 1] - pwh[:, 1] / 2
    b1_y2 = pxy[:, 1] + pwh[:, 1] / 2
    b2_x1 = txy[:, 0] - twh[:, 0] / 2
    b2_x2 = txy[:, 0] + twh[:, 0] / 2
    b2_y1 = txy[:, 1] - twh[:, 1] / 2
    b2_y2 = txy[:, 1] + twh[:, 1] / 2
    inter = (jnp.clip(jnp.minimum(b1_x2, b2_x2) - jnp.maximum(b1_x1, b2_x1), 0.0)
             * jnp.clip(jnp.minimum(b1_y2, b2_y2) - jnp.maximum(b1_y1, b2_y1), 0.0))
    w1, h1 = b1_x2 - b1_x1, b1_y2 - b1_y1 + eps
    w2, h2 = b2_x2 - b2_x1, b2_y2 - b2_y1 + eps
    union = w1 * h1 + w2 * h2 - inter + eps
    return inter / union


def _build_targets_scale(targets7, anchors_i, ny, nx):
    """Static-shape version of YOLOLoss._build_targets for one scale.

    Returns per-candidate (5 * na * nt candidates) tensors plus a validity
    mask (replaces torch's boolean-mask indexing which has dynamic shapes).
    """
    na, nt, _ = targets7.shape
    gain = jnp.array([1.0, 1.0, nx, ny, nx, ny, 1.0], jnp.float32)
    t = targets7 * gain                                       # [na, nt, 7]
    r = t[:, :, 4:6] / anchors_i[:, None, :]                  # [na, nt, 2]
    anch_ok = (jnp.max(jnp.maximum(r, 1.0 / r), axis=2) < 4.0).reshape(na * nt)

    tf = t.reshape(na * nt, 7)
    gxy = tf[:, 2:4]
    gxi = jnp.array([nx, ny], jnp.float32) - gxy
    g = 0.5
    jx = (jnp.mod(gxy[:, 0], 1.0) < g) & (gxy[:, 0] > 1.0)
    ky = (jnp.mod(gxy[:, 1], 1.0) < g) & (gxy[:, 1] > 1.0)
    lx = (jnp.mod(gxi[:, 0], 1.0) < g) & (gxi[:, 0] > 1.0)
    my = (jnp.mod(gxi[:, 1], 1.0) < g) & (gxi[:, 1] > 1.0)
    mask5 = jnp.stack([jnp.ones_like(jx), jx, ky, lx, my], axis=0)  # [5, na*nt]
    valid = (mask5 & anch_ok[None, :]).reshape(-1)                  # [5*na*nt]

    off = jnp.array([[0, 0], [1, 0], [0, 1], [-1, 0], [0, -1]], jnp.float32) * g
    t5 = jnp.broadcast_to(tf[None], (5, na * nt, 7)).reshape(-1, 7)
    offsets = jnp.broadcast_to(off[:, None, :], (5, na * nt, 2)).reshape(-1, 2)

    b = t5[:, 0].astype(jnp.int32)
    c = t5[:, 1].astype(jnp.int32)
    gxy5 = t5[:, 2:4]
    gwh = t5[:, 4:6]
    gij = (gxy5 - offsets).astype(jnp.int32)   # trunc toward 0 (== torch .long())
    gi = jnp.clip(gij[:, 0], 0, nx - 1)
    gj = jnp.clip(gij[:, 1], 0, ny - 1)
    a = t5[:, 6].astype(jnp.int32)
    # torch clamps gij in place before computing tbox -> use clamped values
    gij_cl = jnp.stack([gi, gj], axis=1).astype(jnp.float32)
    tbox = jnp.concatenate([gxy5 - gij_cl, gwh], axis=1)
    anch = anchors_i[a]
    return b, a, gj, gi, tbox, anch, c, valid


# -----------------------------------------------------------------------------
# YOLOLoss.forward
# -----------------------------------------------------------------------------
def yolo_loss(predictions, targets, anchors, num_classes=7,
              box_weight=0.05, obj_weight=1.0, cls_weight=0.5,
              label_smoothing=0.0, img_size=640):
    balance = [4.0, 1.0, 0.4]
    gr = 1.0
    cp = 1.0 - 0.5 * label_smoothing
    cn = 0.5 * label_smoothing

    na = anchors.shape[1]
    nt = targets.shape[0]
    ai = jnp.broadcast_to(jnp.arange(na, dtype=jnp.float32)[:, None], (na, nt))
    targets7 = jnp.concatenate(
        [jnp.broadcast_to(targets[None], (na, nt, 6)), ai[:, :, None]], axis=2)

    lbox = jnp.zeros((), jnp.float32)
    lcls = jnp.zeros((), jnp.float32)
    lobj = jnp.zeros((), jnp.float32)

    for i, pred in enumerate(predictions):
        B, _na, ny, nx, no = pred.shape
        total = B * na * ny * nx
        padded_rows, tile_rows, num_blocks = _obj_tiling(total)
        n_pad = padded_rows * _LANE

        b, a, gj, gi, tbox, anch, tcls, valid = _build_targets_scale(
            targets7, anchors[i], ny, nx)
        vmask = valid.astype(jnp.float32)
        count = jnp.sum(vmask)

        # gather matched predictions (indices always in range; invalid
        # candidates are masked out of every reduction below)
        ps = pred[b, a, gj, gi]                           # [M, no]
        pxy = jax.nn.sigmoid(ps[:, :2]) * 2.0 - 0.5
        pwh = (jax.nn.sigmoid(ps[:, 2:4]) * 2.0) ** 2 * anch
        # TODO(synk): reference _bbox_iou(pbox.T, tbox) only broadcasts when
        # M == 4 (errors otherwise in torch); implemented the intended
        # per-candidate IoU.
        iou = _bbox_iou_xywh(pxy, pwh, tbox[:, :2], tbox[:, 2:4])

        lbox_i = jnp.sum((1.0 - iou) * vmask) / jnp.maximum(count, 1.0)
        lbox = lbox + jnp.where(count > 0, lbox_i, 0.0)

        # tobj[b, a, gj, gi] = 1 - gr + gr * iou.detach().clamp(0)
        # deterministic "last candidate wins" on duplicate cells (matches the
        # sequential in-place indexed assignment of the torch reference),
        # using a small O(M^2) mask (M = 5*na*nt) — no grid-sized helper buffer.
        M = b.shape[0]
        flat_idx = ((b * na + a) * ny + gj) * nx + gi
        order = jnp.arange(M, dtype=jnp.int32)
        later_dup = jnp.any(
            (flat_idx[None, :] == flat_idx[:, None])
            & valid[None, :] & (order[None, :] > order[:, None]), axis=1)
        winner = valid & jnp.logical_not(later_dup)
        tobj_val = 1.0 - gr + gr * jnp.maximum(jax.lax.stop_gradient(iou), 0.0)
        # scatter straight into the kernel-sized padded flat buffer; the pad
        # region stays 0 (its logits are padded with -100 -> zero BCE).
        tobj_flat = jnp.zeros((n_pad,), pred.dtype).at[
            jnp.where(winner, flat_idx, n_pad)].set(
            tobj_val.astype(pred.dtype), mode="drop")

        # classification loss: a few hundred elements -> plain JAX (XLA fuses it)
        if num_classes > 1:
            t_cls = cn + (cp - cn) * jax.nn.one_hot(tcls, num_classes,
                                                    dtype=jnp.float32)
            pc = ps[:, 5:].astype(jnp.float32)
            bce = (jnp.maximum(pc, 0.0) - pc * t_cls
                   + jnp.log1p(jnp.exp(-jnp.abs(pc))))
            lcls_i = jnp.sum(bce * vmask[:, None]) / jnp.maximum(
                count * num_classes, 1.0)
            lcls = lcls + jnp.where(count > 0, lcls_i, 0.0)

        # objectness loss for this scale: streaming Pallas reduction.  The
        # slice + reshape + pad of the obj logits is one XLA fusion (one HBM
        # write); the per-scale balance/mean weight is a Python float applied
        # to the tiny partial sum in the epilogue.
        # TODO(synk): reference adds the un-reduced [B,A,H,W] BCE tensor to a
        # scalar (runtime error in torch); implemented the intended YOLOv5
        # mean-reduction semantics.
        obj_logits = jnp.pad(pred[..., 4].reshape(-1), (0, n_pad - total),
                             constant_values=-100.0)
        lobj_i = obj_bce_sum(obj_logits.reshape(padded_rows, _LANE),
                             tobj_flat.reshape(padded_rows, _LANE),
                             tile_rows, num_blocks)
        lobj = lobj + (balance[i] / float(total)) * lobj_i

    lbox = lbox * box_weight
    lobj = lobj * obj_weight
    lcls = lcls * cls_weight
    total_loss = lbox + lobj + lcls
    return total_loss, {"box_loss": lbox, "obj_loss": lobj,
                        "cls_loss": lcls, "total_loss": total_loss}


if __name__ == "__main__":
    key = jax.random.PRNGKey(0)
    B = 2
    num_classes = 7
    na = 3
    no = 5 + num_classes

    # deterministic anchors in grid units (stride-normalized YOLOv5 anchors) so
    # that the anchor-ratio filter produces positive matches at small grids
    anchors = jnp.array(
        [[[1.25, 1.625], [2.0, 3.75], [4.125, 2.875]],
         [[1.875, 3.8125], [3.875, 2.8125], [3.6875, 7.4375]],
         [[3.625, 2.8125], [4.875, 6.1875], [11.65625, 10.1875]]],
        dtype=jnp.float32)

    grid_sizes = [(16, 16), (8, 8), (4, 4)]   # (ny, nx) for P3 / P4 / P5
    keys = jax.random.split(key, 8)
    predictions = []
    for s, (ny, nx) in enumerate(grid_sizes):
        predictions.append(
            0.5 * jax.random.normal(keys[s], (B, na, ny, nx, no), jnp.float32))

    nt = 6
    b_idx = jax.random.randint(keys[3], (nt, 1), 0, B).astype(jnp.float32)
    cls_idx = jax.random.randint(keys[4], (nt, 1), 0,
                                 num_classes).astype(jnp.float32)
    xy = jax.random.uniform(keys[5], (nt, 2), minval=0.05, maxval=0.95)
    wh = jax.random.uniform(keys[6], (nt, 2), minval=0.1, maxval=0.5)
    targets = jnp.concatenate([b_idx, cls_idx, xy, wh], axis=1).astype(jnp.float32)

    loss_fn = jax.jit(functools.partial(yolo_loss, num_classes=num_classes))
    total_loss, loss_dict = loss_fn(predictions, targets, anchors)
    jax.block_until_ready(total_loss)
    print("KERNEL_OK")
</pallas_src>

<mosaic_0001>
module attributes {stable_mosaic.version = 11 : i64} {
  func.func @_bce_partial_kernel(%arg0: i32, %arg1: memref<8x128xf32, #tpu.memory_space<vmem>>, %arg2: memref<8x128xf32, #tpu.memory_space<vmem>>, %arg3: memref<8x128xf32, #tpu.memory_space<vmem>>) attributes {dimension_semantics = [#tpu.dimension_semantics<parallel>], iteration_bounds = array<i64: 1>, scalar_prefetch = 0 : i64, scratch_operands = 0 : i64, tpu.core_type = #tpu.core_type<tc>, window_params = [{transform_indices = @transform_0, window_bounds = array<i64: 8, 128>}, {transform_indices = @transform_1, window_bounds = array<i64: 8, 128>}, {transform_indices = @transform_2, window_bounds = array<i64: 8, 128>}]} {
    %c0 = arith.constant 0 : index
    %c0_0 = arith.constant 0 : index
    %0 = vector.load %arg1[%c0, %c0_0] : memref<8x128xf32, #tpu.memory_space<vmem>>, vector<8x128xf32>
    %c0_1 = arith.constant 0 : index
    %c0_2 = arith.constant 0 : index
    %1 = vector.load %arg2[%c0_1, %c0_2] : memref<8x128xf32, #tpu.memory_space<vmem>>, vector<8x128xf32>
    %cst = arith.constant 0.000000e+00 : f32
    %2 = vector.broadcast %cst : f32 to vector<8x128xf32>
    %3 = arith.maximumf %0, %2 : vector<8x128xf32>
    %4 = arith.mulf %0, %1 : vector<8x128xf32>
    %5 = arith.subf %3, %4 : vector<8x128xf32>
    %6 = math.absf %0 : vector<8x128xf32>
    %cst_3 = arith.constant 0.000000e+00 : f32
    %7 = vector.broadcast %cst_3 : f32 to vector<8x128xf32>
    %8 = arith.subf %7, %6 : vector<8x128xf32>
    %9 = math.exp %8 : vector<8x128xf32>
    %10 = math.log1p %9 : vector<8x128xf32>
    %11 = arith.addf %5, %10 : vector<8x128xf32>
    %c0_4 = arith.constant 0 : index
    %c0_5 = arith.constant 0 : index
    %12 = vector.load %arg3[%c0_4, %c0_5] : memref<8x128xf32, #tpu.memory_space<vmem>>, vector<8x128xf32>
    tpu.vector_store %arg3[%c0_4, %c0_5], %11 {strides = array<i32>} : memref<8x128xf32, #tpu.memory_space<vmem>>, vector<8x128xf32>,
    return
  }
  func.func @transform_0(%arg0: i32) -> (i32, i32) {
    %c0_i32 = arith.constant 0 : i32
    %c0_i32_0 = arith.constant 0 : i32
    return %arg0, %c0_i32 : i32, i32
  }
  func.func @transform_1(%arg0: i32) -> (i32, i32) {
    %c0_i32 = arith.constant 0 : i32
    %c0_i32_0 = arith.constant 0 : i32
    return %arg0, %c0_i32 : i32, i32
  }
  func.func @transform_2(%arg0: i32) -> (i32, i32) {
    %c0_i32 = arith.constant 0 : i32
    %c0_i32_0 = arith.constant 0 : i32
    return %arg0, %c0_i32 : i32, i32
  }
}

module attributes {stable_mosaic.version = 11 : i64} {
  func.func @_bce_partial_kernel(%arg0: i32, %arg1: memref<16x128xf32, #tpu.memory_space<vmem>>, %arg2: memref<16x128xf32, #tpu.memory_space<vmem>>, %arg3: memref<8x128xf32, #tpu.memory_space<vmem>>) attributes {dimension_semantics = [#tpu.dimension_semantics<parallel>], iteration_bounds = array<i64: 1>, scalar_prefetch = 0 : i64, scratch_operands = 0 : i64, tpu.core_type = #tpu.core_type<tc>, window_params = [{transform_indices = @transform_0, window_bounds = array<i64: 16, 128>}, {transform_indices = @transform_1, window_bounds = array<i64: 16, 128>}, {transform_indices = @transform_2, window_bounds = array<i64: 8, 128>}]} {
    %c0 = arith.constant 0 : index
    %c0_0 = arith.constant 0 : index
    %0 = vector.load %arg1[%c0, %c0_0] : memref<16x128xf32, #tpu.memory_space<vmem>>, vector<16x128xf32>
    %c0_1 = arith.constant 0 : index
    %c0_2 = arith.constant 0 : index
    %1 = vector.load %arg2[%c0_1, %c0_2] : memref<16x128xf32, #tpu.memory_space<vmem>>, vector<16x128xf32>
    %cst = arith.constant 0.000000e+00 : f32
    %2 = vector.broadcast %cst : f32 to vector<16x128xf32>
    %3 = arith.maximumf %0, %2 : vector<16x128xf32>
    %4 = arith.mulf %0, %1 : vector<16x128xf32>
    %5 = arith.subf %3, %4 : vector<16x128xf32>
    %6 = math.absf %0 : vector<16x128xf32>
    %cst_3 = arith.constant 0.000000e+00 : f32
    %7 = vector.broadcast %cst_3 : f32 to vector<16x128xf32>
    %8 = arith.subf %7, %6 : vector<16x128xf32>
    %9 = math.exp %8 : vector<16x128xf32>
    %10 = math.log1p %9 : vector<16x128xf32>
    %11 = arith.addf %5, %10 : vector<16x128xf32>
    %12 = vector.extract_strided_slice %11 {offsets = [0, 0], sizes = [8, 128], strides = [1, 1]} : vector<16x128xf32> to vector<8x128xf32>
    %13 = vector.extract_strided_slice %11 {offsets = [8, 0], sizes = [8, 128], strides = [1, 1]} : vector<16x128xf32> to vector<8x128xf32>
    %14 = arith.addf %12, %13 : vector<8x128xf32>
    %c0_4 = arith.constant 0 : index
    %c0_5 = arith.constant 0 : index
    %15 = vector.load %arg3[%c0_4, %c0_5] : memref<8x128xf32, #tpu.memory_space<vmem>>, vector<8x128xf32>
    tpu.vector_store %arg3[%c0_4, %c0_5], %14 {strides = array<i32>} : memref<8x128xf32, #tpu.memory_space<vmem>>, vector<8x128xf32>,
    return
  }
  func.func @transform_0(%arg0: i32) -> (i32, i32) {
    %c0_i32 = arith.constant 0 : i32
    %c0_i32_0 = arith.constant 0 : i32
    return %arg0, %c0_i32 : i32, i32
  }
  func.func @transform_1(%arg0: i32) -> (i32, i32) {
    %c0_i32 = arith.constant 0 : i32
    %c0_i32_0 = arith.constant 0 : i32
    return %arg0, %c0_i32 : i32, i32
  }
  func.func @transform_2(%arg0: i32) -> (i32, i32) {
    %c0_i32 = arith.constant 0 : i32
    %c0_i32_0 = arith.constant 0 : i32
    return %arg0, %c0_i32 : i32, i32
  }
}

</mosaic_0001>

<bundles_post_ra>
// kernel: squeeze.191
= control target key start
LH: loop header
LB: loop body
LE: loop exit
PB: predicated region body
PF: predicated region fallthrough
CT: control target
= control target key end

     0   :  { %s213_s18 = smov 84   ;;  %s214_s19 = smov 88   ;;  %vm32_vm0 = vcmask 31744   ;;  %vm38_vm1 = vcmask 786144   ;;  %vm44_vm2 = vcmask 753344   ;;  %vm50_vm3 = vcmask 720544   ;;  %s266_s0 = inlined_call_operand.vmem [shape: f32[2,3,4,4], index: 0, kind: input, shape index: {}]   ;;  %s267_s1 = inlined_call_operand.vmem [shape: f32[96], index: 1, kind: output, shape index: {}]  }
   0x1   :  { %v184_v0 = vld [vmem:[%s266_s0 + $0x14] sm:$0xf]  ;;  %v185_v1 = vld [vmem:[%s266_s0 + $0x10] sm:$0xf]  ;;  %v186_v2 = vld [vmem:[%s266_s0 + $0xc] sm:$0xf] }
   0x2   :  { %9 = vst [vmem:[#allocation1 + $0x28] sm:$0xf] %v184_v0  ;;  %14 = vst [vmem:[#allocation1 + $0x20] sm:$0xf] %v185_v1  ;;  %v187_v3 = vld [vmem:[%s266_s0 + $0x8] sm:$0xf] }
   0x3   :  { %19 = vst [vmem:[#allocation1 + $0x18] sm:$0xf] %v186_v2  ;;  %24 = vst [vmem:[#allocation1 + $0x10] sm:$0xf] %v187_v3  ;;  %v188_v4 = vld [vmem:[%s266_s0 + $0x4] sm:$0xf] }
   0x4   :  { %v29_v5 = vld [vmem:[%s266_s0] sm:$0xf]  ;;  %28 = vst [vmem:[#allocation1 + $0x8] sm:$0xf] %v188_v4  ;;  %s212_s0 = smov 92   ;;  %s215_s20 = smov 80  }
   0x5   :  { %30 = vst [vmem:[#allocation1] sm:$0xf] %v29_v5  ;;  %s216_s21 = smov 76   ;;  %s217_s22 = smov 72   ;;  %vm56_vm4 = vcmask 687744   ;;  %vm62_vm5 = vcmask 654944  }
   0x6   :  { %s218_s23 = smov 68   ;;  %s219_s24 = smov 64   ;;  %vm68_vm6 = vcmask 622144   ;;  %vm74_vm7 = vcmask 589344   ;;  %vm80_vm8 = vcmask 556544   ;;  %vm86_vm9 = vcmask 523744  }
   0x7   :  { %s220_s25 = smov 60   ;;  %s221_s26 = smov 56   ;;  %vm92_vm10 = vcmask 490944   ;;  %vm98_vm11 = vcmask 458144   ;;  %vm104_vm12 = vcmask 425344   ;;  %vm110_vm13 = vcmask 392544  }
   0x8   :  { %s222_s27 = smov 52   ;;  %s223_s28 = smov 48   ;;  %vm116_vm14 = vcmask 359744   ;;  %vm122_vm15 = vcmask 326944  }
   0x9   :  { %v35_v6 = vld [vmem:[#allocation1 + $0x2b] sm:$0x1]   ;;  %v47_v7 = vld [vmem:[#allocation1 + $0x29] sm:$0x1]   ;;  %v41_v8 = vld [vmem:[#allocation1 + $0x2a] sm:$0x1]  }
   0xa   :  { %36 = vrot.lane.b32.xlu0 %v35_v6, %s212_s0  ;;  %48 = vrot.lane.b32.xlu1 %v47_v7, %s213_s18  ;;  %v53_v9 = vld [vmem:[#allocation1 + $0x28] sm:$0x1]   ;;  %v59_v10 = vld [vmem:[#allocation1 + $0x23] sm:$0x1]   ;;  %v65_v11 = vld [vmem:[#allocation1 + $0x22] sm:$0x1]  }
   0xb   :  { %v71_v13 = vld [vmem:[#allocation1 + $0x21] sm:$0x1]   ;;  %v77_v14 = vld [vmem:[#allocation1 + $0x20] sm:$0x1]   ;;  %v83_v15 = vld [vmem:[#allocation1 + $0x1b] sm:$0x1]  }
   0xc   :  { %v31_v12 = vld [vmem:[#allocation1] sm:$0x1]   ;;  %v89_v16 = vld [vmem:[#allocation1 + $0x1a] sm:$0x1]   ;;  %v95_v17 = vld [vmem:[#allocation1 + $0x19] sm:$0x1]  }
   0xd   :  { %33 = vst.msk [vmem:[#allocation0] sm:$0x1] %vm32_vm0, %v31_v12   ;;  %v101_v18 = vld [vmem:[#allocation1 + $0x18] sm:$0x1]   ;;  %v107_v19 = vld [vmem:[#allocation1 + $0x13] sm:$0x1]  }
   0xe   :  { %42 = vrot.lane.b32.xlu0 %v41_v8, %s214_s19  ;;  %54 = vrot.lane.b32.xlu1 %v53_v9, %s215_s20  ;;  %v113_v20 = vld [vmem:[#allocation1 + $0x12] sm:$0x1]   ;;  %s224_s29 = smov 44   ;;  %s225_s30 = smov 40   ;;  %v119_v21 = vld [vmem:[#allocation1 + $0x11] sm:$0x1]  }
   0xf   :  { %v125_v22 = vld [vmem:[#allocation1 + $0x10] sm:$0x1]   ;;  %s226_s2 = smov 36   ;;  %s227_s3 = smov 32   ;;  %v131_v23 = vld [vmem:[#allocation1 + $0xb] sm:$0x1]  }
  0x10   :  { %v137_v24 = vld [vmem:[#allocation1 + $0xa] sm:$0x1]   ;;  %s228_s4 = smov 28   ;;  %s229_s5 = smov 24   ;;  %v143_v25 = vld [vmem:[#allocation1 + $0x9] sm:$0x1]  }
  0x11   :  { %v149_v26 = vld [vmem:[#allocation1 + $0x8] sm:$0x1]   ;;  %s230_s6 = smov 20   ;;  %s231_s7 = smov 16   ;;  %v155_v27 = vld [vmem:[#allocation1 + $0x3] sm:$0x1]  }
  0x12   :  { %60 = vrot.lane.b32.xlu0 %v59_v10, %s216_s21  ;;  %66 = vrot.lane.b32.xlu1 %v65_v11, %s217_s22  ;;  %v161_v28 = vld [vmem:[#allocation1 + $0x2] sm:$0x1]   ;;  %s232_s8 = smov 12   ;;  %s233_s9 = smov 8   ;;  %v167_v29 = vld [vmem:[#allocation1 + $0x1] sm:$0x1]  }
  0x13   :  { %s234_s10 = smov 4   ;;  %vm128_vm0 = vcmask 294144  }
  0x16   :  { %72 = vrot.lane.b32.xlu0 %v71_v13, %s218_s23  ;;  %78 = vrot.lane.b32.xlu1 %v77_v14, %s219_s24 }
  0x1a   :  { %84 = vrot.lane.b32.xlu0 %v83_v15, %s220_s25  ;;  %90 = vrot.lane.b32.xlu1 %v89_v16, %s221_s26 }
  0x1e   :  { %96 = vrot.lane.b32.xlu0 %v95_v17, %s222_s27  ;;  %102 = vrot.lane.b32.xlu1 %v101_v18, %s223_s28 }
  0x22   :  { %108 = vrot.lane.b32.xlu0 %v107_v19, %s224_s29  ;;  %114 = vrot.lane.b32.xlu1 %v113_v20, %s225_s30 }
  0x26   :  { %120 = vrot.lane.b32.xlu0 %v119_v21, %s226_s2  ;;  %126 = vrot.lane.b32.xlu1 %v125_v22, %s227_s3 }
  0x2a   :  { %132 = vrot.lane.b32.xlu0 %v131_v23, %s228_s4  ;;  %138 = vrot.lane.b32.xlu1 %v137_v24, %s229_s5 }
  0x2e   :  { %144 = vrot.lane.b32.xlu0 %v143_v25, %s230_s6  ;;  %150 = vrot.lane.b32.xlu1 %v149_v26, %s231_s7 }
  0x32   :  { %156 = vrot.lane.b32.xlu0 %v155_v27, %s232_s8  ;;  %162 = vrot.lane.b32.xlu1 %v161_v28, %s233_s9 }
  0x36   :  { %168 = vrot.lane.b32.xlu0 %v167_v29, %s234_s10 }
  0x7c   :  { %v37_v30 = vpop.permute.xlu0 %36   ;;  %v49_v31 = vpop.permute.xlu1 %48  }
  0x7d   :  { %39 = vst.msk [vmem:[#allocation0] sm:$0x1] %vm38_vm1, %v37_v30   ;;  %vm134_vm1 = vcmask 261344  }
  0x80   :  { %v43_v32 = vpop.permute.xlu0 %42   ;;  %v55_v33 = vpop.permute.xlu1 %54  }
  0x81   :  { %45 = vst.msk [vmem:[#allocation0] sm:$0x1] %vm44_vm2, %v43_v32   ;;  %vm140_vm2 = vcmask 228544  }
  0x82   :  { %51 = vst.msk [vmem:[#allocation0] sm:$0x1] %vm50_vm3, %v49_v31   ;;  %vm146_vm3 = vcmask 195744  }
  0x83   :  { %57 = vst.msk [vmem:[#allocation0] sm:$0x1] %vm56_vm4, %v55_v33   ;;  %vm152_vm4 = vcmask 162944  }
  0x84   :  { %v61_v34 = vpop.permute.xlu0 %60   ;;  %v67_v35 = vpop.permute.xlu1 %66  }
  0x85   :  { %63 = vst.msk [vmem:[#allocation0] sm:$0x1] %vm62_vm5, %v61_v34   ;;  %vm158_vm5 = vcmask 130144  }
  0x86   :  { %69 = vst.msk [vmem:[#allocation0] sm:$0x1] %vm68_vm6, %v67_v35   ;;  %vm164_vm6 = vcmask 97344  }
  0x88   :  { %v73_v36 = vpop.permute.xlu0 %72   ;;  %v79_v37 = vpop.permute.xlu1 %78  }
  0x89   :  { %75 = vst.msk [vmem:[#allocation0] sm:$0x1] %vm74_vm7, %v73_v36   ;;  %vm170_vm7 = vcmask 64544  }
  0x8a   :  { %81 = vst.msk [vmem:[#allocation0] sm:$0x1] %vm80_vm8, %v79_v37  }
  0x8c   :  { %v85_v38 = vpop.permute.xlu0 %84   ;;  %v91_v39 = vpop.permute.xlu1 %90  }
  0x8d   :  { %87 = vst.msk [vmem:[#allocation0] sm:$0x1] %vm86_vm9, %v85_v38  }
  0x8e   :  { %93 = vst.msk [vmem:[#allocation0] sm:$0x1] %vm92_vm10, %v91_v39  }
  0x90   :  { %v97_v40 = vpop.permute.xlu0 %96   ;;  %v103_v41 = vpop.permute.xlu1 %102  }
  0x91   :  { %99 = vst.msk [vmem:[#allocation0] sm:$0x1] %vm98_vm11, %v97_v40  }
  0x92   :  { %105 = vst.msk [vmem:[#allocation0] sm:$0x1] %vm104_vm12, %v103_v41  }
  0x94   :  { %v109_v42 = vpop.permute.xlu0 %108   ;;  %v115_v43 = vpop.permute.xlu1 %114  }
  0x95   :  { %111 = vst.msk [vmem:[#allocation0] sm:$0x1] %vm110_vm13, %v109_v42  }
  0x96   :  { %117 = vst.msk [vmem:[#allocation0] sm:$0x1] %vm116_vm14, %v115_v43  }
  0x98   :  { %v121_v44 = vpop.permute.xlu0 %120   ;;  %v127_v45 = vpop.permute.xlu1 %126  }
  0x99   :  { %123 = vst.msk [vmem:[#allocation0] sm:$0x1] %vm122_vm15, %v121_v44  }
  0x9a   :  { %129 = vst.msk [vmem:[#allocation0] sm:$0x1] %vm128_vm0, %v127_v45  }
  0x9c   :  { %v133_v46 = vpop.permute.xlu0 %132   ;;  %v139_v47 = vpop.permute.xlu1 %138  }
  0x9d   :  { %135 = vst.msk [vmem:[#allocation0] sm:$0x1] %vm134_vm1, %v133_v46  }
  0x9e   :  { %141 = vst.msk [vmem:[#allocation0] sm:$0x1] %vm140_vm2, %v139_v47  }
  0xa0   :  { %v145_v48 = vpop.permute.xlu0 %144   ;;  %v151_v49 = vpop.permute.xlu1 %150  }
  0xa1   :  { %147 = vst.msk [vmem:[#allocation0] sm:$0x1] %vm146_vm3, %v145_v48  }
  0xa2   :  { %153 = vst.msk [vmem:[#allocation0] sm:$0x1] %vm152_vm4, %v151_v49  }
  0xa4   :  { %v157_v50 = vpop.permute.xlu0 %156   ;;  %v163_v51 = vpop.permute.xlu1 %162  }
  0xa5   :  { %159 = vst.msk [vmem:[#allocation0] sm:$0x1] %vm158_vm5, %v157_v50  }
  0xa6   :  { %165 = vst.msk [vmem:[#allocation0] sm:$0x1] %vm164_vm6, %v163_v51  }
  0xa8   :  { %v169_v52 = vpop.permute.xlu0 %168  }
  0xa9   :  { %171 = vst.msk [vmem:[#allocation0] sm:$0x1] %vm170_vm7, %v169_v52  }
  0xb0   :  { %v176_v53 = vld [vmem:[#allocation0] sm:$0x1] }
  0xb1   :  { %179 = vst [vmem:[%s267_s1] sm:$0x1] %v176_v53 }

// kernel: squeeze.159
= control target key start
LH: loop header
LB: loop body
LE: loop exit
PB: predicated region body
PF: predicated region fallthrough
CT: control target
= control target key end

     0   :  { %vm6_vm0 = vcmask 1042434   ;;  %s11_s6 = smov 3  ;;  %s33_s11 = smov 3  ;;  %vm8_vm1 = vcmask 64512   ;;  %vm19_vm2 = vcmask 1048512   ;;  %vm30_vm3 = vcmask 982912   ;;  %s369_s0 = inlined_call_operand.vmem [shape: f32[2,3,8,8], index: 0, kind: input, shape index: {}]   ;;  %s370_s1 = inlined_call_operand.vmem [shape: f32[384], index: 1, kind: output, shape index: {}]  }
   0x1   :  { %v185_v0 = vld [vmem:[%s369_s0 + $0x2d] sm:$0x4]   ;;  %v189_v2 = vld [vmem:[%s369_s0 + $0x2b] sm:$0x4]   ;;  %s22_s16 = smov 3  ;;  %s229_s19 = smov 120  }
   0x2   :  { %v184_v1 = vld [vmem:[%s369_s0 + $0xf] ss:$16 sm:%s11_s6]   ;;  %v188_v4 = vld [vmem:[%s369_s0 + $0xd] ss:$16 sm:%s33_s11]   ;;  %s44_s22 = smov 3  ;;  %s230_s25 = smov 104  }
   0x3   :  { %v16_v3 = vsel %vm6_vm0, %v185_v0, %v184_v1  ;;  %v187_v5 = vld [vmem:[%s369_s0 + $0x2c] sm:$0x4]   ;;  %v38_v6 = vsel %vm6_vm0, %v189_v2, %v188_v4  ;;  %v191_v8 = vld [vmem:[%s369_s0 + $0x2a] sm:$0x4]   ;;  %s55_s28 = smov 3  ;;  %s66_s4 = smov 3 }
   0x4   :  { %17 = vrot.lane.b32.xlu0 %v16_v3, %s229_s19  ;;  %v186_v7 = vld [vmem:[%s369_s0 + $0xe] ss:$16 sm:%s22_s16]   ;;  %39 = vrot.lane.b32.xlu1 %v38_v6, %s230_s25  ;;  %s77_s9 = smov 3  ;;  %s231_s10 = smov 112   ;;  %vm41_vm4 = vcmask 917312   ;;  %vm52_vm5 = vcmask 851712  }
   0x5   :  { %v27_v9 = vsel %vm6_vm0, %v187_v5, %v186_v7  ;;  %v190_v10 = vld [vmem:[%s369_s0 + $0xc] ss:$16 sm:%s44_s22]   ;;  %v192_v12 = vld [vmem:[%s369_s0 + $0xb] ss:$16 sm:%s55_s28]   ;;  %s88_s11 = smov 3  ;;  %s232_s12 = smov 96  }
   0x6   :  { %v49_v11 = vsel %vm6_vm0, %v191_v8, %v190_v10  ;;  %v193_v13 = vld [vmem:[%s369_s0 + $0x29] sm:$0x4]   ;;  %v194_v14 = vld [vmem:[%s369_s0 + $0xa] ss:$16 sm:%s66_s4]   ;;  %v197_v19 = vld [vmem:[%s369_s0 + $0x27] sm:$0x4]  }
   0x7   :  { %v195_v15 = vld [vmem:[%s369_s0 + $0x28] sm:$0x4]   ;;  %v60_v16 = vsel %vm6_vm0, %v193_v13, %v192_v12  ;;  %v196_v18 = vld [vmem:[%s369_s0 + $0x9] ss:$16 sm:%s77_s9]   ;;  %v199_v21 = vld [vmem:[%s369_s0 + $0x26] sm:$0x4]  }
   0x8   :  { %28 = vrot.lane.b32.xlu0 %v27_v9, %s231_s10  ;;  %50 = vrot.lane.b32.xlu1 %v49_v11, %s232_s12  ;;  %v71_v17 = vsel %vm6_vm0, %v195_v15, %v194_v14  ;;  %v198_v20 = vld [vmem:[%s369_s0 + $0x8] ss:$16 sm:%s88_s11]   ;;  %s99_s21 = smov 3  ;;  %s233_s22 = smov 88   ;;  %v82_v22 = vsel %vm6_vm0, %v197_v19, %v196_v18  ;;  %vm63_vm6 = vcmask 786112   ;;  %vm74_vm7 = vcmask 720512  }
   0x9   :  { %s110_s23 = smov 3  ;;  %s234_s24 = smov 80   ;;  %v93_v23 = vsel %vm6_vm0, %v199_v21, %v198_v20  ;;  %v200_v24 = vld [vmem:[%s369_s0 + $0x7] ss:$16 sm:%s99_s21]   ;;  %v203_v27 = vld [vmem:[%s369_s0 + $0x24] sm:$0x4]  }
   0xa   :  { %v201_v25 = vld [vmem:[%s369_s0 + $0x25] sm:$0x4]   ;;  %v202_v26 = vld [vmem:[%s369_s0 + $0x6] ss:$16 sm:%s110_s23]   ;;  %s121_s4 = smov 3  ;;  %s235_s5 = smov 72  }
   0xb   :  { %s132_s6 = smov 3  ;;  %s2_s7 = smov 3  ;;  %v183_v28 = vld [vmem:[%s369_s0 + $0x1e] sm:$0x4]   ;;  %v104_v29 = vsel %vm6_vm0, %v201_v25, %v200_v24  ;;  %v115_v31 = vsel %vm6_vm0, %v203_v27, %v202_v26  ;;  %v204_v32 = vld [vmem:[%s369_s0 + $0x5] ss:$16 sm:%s121_s4]  }
   0xc   :  { %61 = vrot.lane.b32.xlu0 %v60_v16, %s233_s22  ;;  %72 = vrot.lane.b32.xlu1 %v71_v17, %s234_s24  ;;  %s236_s10 = smov 64   ;;  %v3_v30 = vld [vmem:[%s369_s0] ss:$16 sm:%s2_s7]   ;;  %s143_s21 = smov 3  ;;  %vm85_vm8 = vcmask 654912   ;;  %vm96_vm9 = vcmask 589312  }
   0xd   :  { %v205_v33 = vld [vmem:[%s369_s0 + $0x23] sm:$0x4]   ;;  %v7_v34 = vsel %vm6_vm0, %v183_v28, %v3_v30  ;;  %v206_v35 = vld [vmem:[%s369_s0 + $0x4] ss:$16 sm:%s132_s6]   ;;  %s237_s22 = smov 56   ;;  %s154_s23 = smov 3 }
   0xe   :  { %v207_v36 = vld [vmem:[%s369_s0 + $0x22] sm:$0x4]   ;;  %9 = vst.msk [vmem:[#allocation0] sm:$0x7] %vm8_vm1, %v7_v34   ;;  %s238_s24 = smov 48   ;;  %v126_v37 = vsel %vm6_vm0, %v205_v33, %v204_v32  ;;  %s165_s4 = smov 3 }
   0xf   :  { %v137_v38 = vsel %vm6_vm0, %v207_v36, %v206_v35  ;;  %v208_v39 = vld [vmem:[%s369_s0 + $0x3] ss:$16 sm:%s143_s21]   ;;  %v210_v41 = vld [vmem:[%s369_s0 + $0x2] ss:$16 sm:%s154_s23]   ;;  %s240_s6 = smov 32   ;;  %s242_s11 = smov 16  }
  0x10   :  { %83 = vrot.lane.b32.xlu0 %v82_v22, %s235_s5  ;;  %94 = vrot.lane.b32.xlu1 %v93_v23, %s236_s10  ;;  %v209_v40 = vld [vmem:[%s369_s0 + $0x21] sm:$0x4]   ;;  %v211_v42 = vld [vmem:[%s369_s0 + $0x20] sm:$0x4]   ;;  %s239_s5 = smov 40   ;;  %s243_s12 = smov 8  }
  0x11   :  { %v148_v43 = vsel %vm6_vm0, %v209_v40, %v208_v39  ;;  %v159_v44 = vsel %vm6_vm0, %v211_v42, %v210_v41  ;;  %v212_v45 = vld [vmem:[%s369_s0 + $0x1] ss:$16 sm:%s165_s4]   ;;  %vm107_vm10 = vcmask 523712   ;;  %vm118_vm11 = vcmask 458112  }
  0x12   :  { %v213_v46 = vld [vmem:[%s369_s0 + $0x1f] sm:$0x4]   ;;  %s241_s0 = smov 24   ;;  %vm129_vm12 = vcmask 392512   ;;  %vm140_vm13 = vcmask 326912   ;;  %vm151_vm14 = vcmask 261312  }
  0x13   :  { %v170_v47 = vsel %vm6_vm0, %v213_v46, %v212_v45  ;;  %vm162_vm15 = vcmask 195712   ;;  %vm173_vm0 = vcmask 130112  }
  0x14   :  { %105 = vrot.lane.b32.xlu0 %v104_v29, %s237_s22  ;;  %116 = vrot.lane.b32.xlu1 %v115_v31, %s238_s24 }
  0x18   :  { %127 = vrot.lane.b32.xlu0 %v126_v37, %s239_s5  ;;  %138 = vrot.lane.b32.xlu1 %v137_v38, %s240_s6 }
  0x1c   :  { %149 = vrot.lane.b32.xlu0 %v148_v43, %s241_s0  ;;  %160 = vrot.lane.b32.xlu1 %v159_v44, %s242_s11 }
  0x20   :  { %171 = vrot.lane.b32.xlu0 %v170_v47, %s243_s12 }
  0x76   :  { %v18_v48 = vpop.permute.xlu0 %17   ;;  %v40_v49 = vpop.permute.xlu1 %39  }
  0x77   :  { %20 = vst.msk [vmem:[#allocation0] sm:$0x7] %vm19_vm2, %v18_v48  }
  0x7a   :  { %v29_v50 = vpop.permute.xlu0 %28   ;;  %v51_v51 = vpop.permute.xlu1 %50  }
  0x7b   :  { %31 = vst.msk [vmem:[#allocation0] sm:$0x7] %vm30_vm3, %v29_v50  }
  0x7c   :  { %42 = vst.msk [vmem:[#allocation0] sm:$0x7] %vm41_vm4, %v40_v49  }
  0x7d   :  { %53 = vst.msk [vmem:[#allocation0] sm:$0x7] %vm52_vm5, %v51_v51  }
  0x7e   :  { %v62_v52 = vpop.permute.xlu0 %61   ;;  %v73_v53 = vpop.permute.xlu1 %72  }
  0x7f   :  { %64 = vst.msk [vmem:[#allocation0] sm:$0x7] %vm63_vm6, %v62_v52  }
  0x80   :  { %75 = vst.msk [vmem:[#allocation0] sm:$0x7] %vm74_vm7, %v73_v53  }
  0x82   :  { %v84_v54 = vpop.permute.xlu0 %83   ;;  %v95_v55 = vpop.permute.xlu1 %94  }
  0x83   :  { %86 = vst.msk [vmem:[#allocation0] sm:$0x7] %vm85_vm8, %v84_v54  }
  0x84   :  { %97 = vst.msk [vmem:[#allocation0] sm:$0x7] %vm96_vm9, %v95_v55  }
  0x86   :  { %v106_v56 = vpop.permute.xlu0 %105   ;;  %v117_v57 = vpop.permute.xlu1 %116  }
  0x87   :  { %108 = vst.msk [vmem:[#allocation0] sm:$0x7] %vm107_vm10, %v106_v56  }
  0x88   :  { %119 = vst.msk [vmem:[#allocation0] sm:$0x7] %vm118_vm11, %v117_v57  }
  0x8a   :  { %v128_v58 = vpop.permute.xlu0 %127   ;;  %v139_v59 = vpop.permute.xlu1 %138  }
  0x8b   :  { %130 = vst.msk [vmem:[#allocation0] sm:$0x7] %vm129_vm12, %v128_v58  }
  0x8c   :  { %141 = vst.msk [vmem:[#allocation0] sm:$0x7] %vm140_vm13, %v139_v59  }
  0x8e   :  { %v150_v60 = vpop.permute.xlu0 %149   ;;  %v161_v61 = vpop.permute.xlu1 %160  }
  0x8f   :  { %152 = vst.msk [vmem:[#allocation0] sm:$0x7] %vm151_vm14, %v150_v60  }
  0x90   :  { %163 = vst.msk [vmem:[#allocation0] sm:$0x7] %vm162_vm15, %v161_v61  }
  0x92   :  { %v172_v62 = vpop.permute.xlu0 %171  }
  0x93   :  { %174 = vst.msk [vmem:[#allocation0] sm:$0x7] %vm173_vm0, %v172_v62  }
  0x9a   :  { %v179_v63 = vld [vmem:[#allocation0] sm:$0xf] }
  0x9b   :  { %182 = vst [vmem:[%s370_s1] sm:$0xf] %v179_v63 }

// kernel: squeeze.127
= control target key start
LH: loop header
LB: loop body
LE: loop exit
PB: predicated region body
PF: predicated region fallthrough
CT: control target
= control target key end

     0   :  { %vm4_vm0 = vcmask 1047556   ;;  %s169_s14 = smov 96   ;;  %s170_s15 = smov 112   ;;  %vm6_vm1 = vcmask 130048   ;;  %vm21_vm2 = vcmask 1048448   ;;  %vm38_vm3 = vcmask 917248   ;;  %s314_s0 = inlined_call_operand.vmem [shape: f32[2,3,16,16,1], index: 0, kind: input, shape index: {}]   ;;  %s315_s1 = inlined_call_operand.vmem [shape: f32[1536], index: 1, kind: output, shape index: {}]  }
   0x1   :  { %v138_v0 = vld [vmem:[%s314_s0 + $0x6] ss:$8 sm:$0xf]   ;;  %v134_v3 = vld [vmem:[%s314_s0 + $0x7] ss:$8 sm:$0xf]  }
   0x2   :  { %v139_v1 = vld [vmem:[%s314_s0 + $0x6] ss:$8 sm:$0xf0]   ;;  %v135_v4 = vld [vmem:[%s314_s0 + $0x7] ss:$8 sm:$0xf0]  }
   0x3   :  { %v35_v2 = vsel %vm4_vm0, %v139_v1, %v138_v0  ;;  %v18_v5 = vsel %vm4_vm0, %v135_v4, %v134_v3  ;;  %v140_v6 = vld [vmem:[%s314_s0 + $0x46] ss:$8 sm:$0xf]   ;;  %v136_v7 = vld [vmem:[%s314_s0 + $0x47] ss:$8 sm:$0xf]  }
   0x4   :  { %36 = vrot.lane.b32.xlu1 %v35_v2, %s169_s14  ;;  %19 = vrot.lane.b32.xlu0 %v18_v5, %s170_s15  ;;  %v142_v8 = vld [vmem:[%s314_s0 + $0x5] ss:$8 sm:$0xf]   ;;  %v146_v12 = vld [vmem:[%s314_s0 + $0x4] ss:$8 sm:$0xf]  }
   0x5   :  { %v143_v9 = vld [vmem:[%s314_s0 + $0x5] ss:$8 sm:$0xf0]   ;;  %v147_v13 = vld [vmem:[%s314_s0 + $0x4] ss:$8 sm:$0xf0]  }
   0x6   :  { %v144_v10 = vld [vmem:[%s314_s0 + $0x45] ss:$8 sm:$0xf]   ;;  %v52_v11 = vsel %vm4_vm0, %v143_v9, %v142_v8  ;;  %s171_s30 = smov 80   ;;  %v69_v16 = vsel %vm4_vm0, %v147_v13, %v146_v12  ;;  %s173_s25 = smov 48   ;;  %vm55_vm4 = vcmask 786048  }
   0x7   :  { %v148_v14 = vld [vmem:[%s314_s0 + $0x44] ss:$8 sm:$0xf]   ;;  %v150_v15 = vld [vmem:[%s314_s0 + $0x3] ss:$8 sm:$0xf]  }
   0x8   :  { %42 = vrot.lane.b32.xlu1 %v140_v6, %s169_s14  ;;  %25 = vrot.lane.b32.xlu0 %v136_v7, %s170_s15  ;;  %v2_v17 = vld [vmem:[%s314_s0] ss:$8 sm:$0xf]   ;;  %v151_v19 = vld [vmem:[%s314_s0 + $0x3] ss:$8 sm:$0xf0]  }
   0x9   :  { %v3_v18 = vld [vmem:[%s314_s0] ss:$8 sm:$0xf0]   ;;  %s172_s14 = smov 64   ;;  %v86_v23 = vsel %vm4_vm0, %v151_v19, %v150_v15  ;;  %s174_s3 = smov 32   ;;  %vm72_vm5 = vcmask 654848  }
   0xa   :  { %v5_v20 = vsel %vm4_vm0, %v3_v18, %v2_v17  ;;  %v132_v21 = vld [vmem:[%s314_s0 + $0x40] ss:$8 sm:$0xf]   ;;  %v152_v22 = vld [vmem:[%s314_s0 + $0x43] ss:$8 sm:$0xf]  }
   0xb   :  { %7 = vst.msk [vmem:[%s315_s1] sm:$0xff] %vm6_vm1, %v5_v20   ;;  %133 = vst.msk [vmem:[%s315_s1 + $0x8] sm:$0xf] %vm6_vm1, %v132_v21   ;;  %v154_v24 = vld [vmem:[%s314_s0 + $0x2] ss:$8 sm:$0xf]  }
   0xc   :  { %59 = vrot.lane.b32.xlu1 %v144_v10, %s171_s30  ;;  %53 = vrot.lane.b32.xlu0 %v52_v11, %s171_s30  ;;  %v155_v25 = vld [vmem:[%s314_s0 + $0x2] ss:$8 sm:$0xf0]   ;;  %v158_v28 = vld [vmem:[%s314_s0 + $0x1] ss:$8 sm:$0xf]  }
   0xd   :  { %v156_v26 = vld [vmem:[%s314_s0 + $0x42] ss:$8 sm:$0xf]   ;;  %v103_v27 = vsel %vm4_vm0, %v155_v25, %v154_v24  ;;  %v159_v29 = vld [vmem:[%s314_s0 + $0x1] ss:$8 sm:$0xf0]  }
   0xe   :  { %v160_v30 = vld [vmem:[%s314_s0 + $0x41] ss:$8 sm:$0xf]   ;;  %v120_v31 = vsel %vm4_vm0, %v159_v29, %v158_v28  ;;  %s175_s0 = smov 16   ;;  %vm89_vm6 = vcmask 523648   ;;  %vm106_vm7 = vcmask 392448  }
   0xf   :  { %vm123_vm8 = vcmask 261248  }
  0x10   :  { %76 = vrot.lane.b32.xlu1 %v148_v14, %s172_s14  ;;  %70 = vrot.lane.b32.xlu0 %v69_v16, %s172_s14 }
  0x14   :  { %93 = vrot.lane.b32.xlu1 %v152_v22, %s173_s25  ;;  %87 = vrot.lane.b32.xlu0 %v86_v23, %s173_s25 }
  0x18   :  { %110 = vrot.lane.b32.xlu1 %v156_v26, %s174_s3  ;;  %104 = vrot.lane.b32.xlu0 %v103_v27, %s174_s3 }
  0x1c   :  { %127 = vrot.lane.b32.xlu1 %v160_v30, %s175_s0  ;;  %121 = vrot.lane.b32.xlu0 %v120_v31, %s175_s0 }
  0x76   :  { %v37_v32 = vpop.permute.xlu1 %36   ;;  %v20_v33 = vpop.permute.xlu0 %19  }
  0x77   :  { %22 = vst.msk [vmem:[%s315_s1] sm:$0xff] %vm21_vm2, %v20_v33  }
  0x78   :  { %39 = vst.msk [vmem:[%s315_s1] sm:$0xff] %vm38_vm3, %v37_v32  }
  0x7a   :  { %v43_v34 = vpop.permute.xlu1 %42   ;;  %v26_v35 = vpop.permute.xlu0 %25  }
  0x7b   :  { %137 = vst.msk [vmem:[%s315_s1 + $0x8] sm:$0xf] %vm21_vm2, %v26_v35  }
  0x7c   :  { %141 = vst.msk [vmem:[%s315_s1 + $0x8] sm:$0xf] %vm38_vm3, %v43_v34  }
  0x7e   :  { %v60_v36 = vpop.permute.xlu1 %59   ;;  %v54_v37 = vpop.permute.xlu0 %53  }
  0x7f   :  { %145 = vst.msk [vmem:[%s315_s1 + $0x8] sm:$0xf] %vm55_vm4, %v60_v36   ;;  %56 = vst.msk [vmem:[%s315_s1] sm:$0xff] %vm55_vm4, %v54_v37  }
  0x82   :  { %v77_v38 = vpop.permute.xlu1 %76   ;;  %v71_v39 = vpop.permute.xlu0 %70  }
  0x83   :  { %149 = vst.msk [vmem:[%s315_s1 + $0x8] sm:$0xf] %vm72_vm5, %v77_v38   ;;  %73 = vst.msk [vmem:[%s315_s1] sm:$0xff] %vm72_vm5, %v71_v39  }
  0x86   :  { %v94_v40 = vpop.permute.xlu1 %93   ;;  %v88_v41 = vpop.permute.xlu0 %87  }
  0x87   :  { %153 = vst.msk [vmem:[%s315_s1 + $0x8] sm:$0xf] %vm89_vm6, %v94_v40   ;;  %90 = vst.msk [vmem:[%s315_s1] sm:$0xff] %vm89_vm6, %v88_v41  }
  0x8a   :  { %v111_v42 = vpop.permute.xlu1 %110   ;;  %v105_v43 = vpop.permute.xlu0 %104  }
  0x8b   :  { %157 = vst.msk [vmem:[%s315_s1 + $0x8] sm:$0xf] %vm106_vm7, %v111_v42   ;;  %107 = vst.msk [vmem:[%s315_s1] sm:$0xff] %vm106_vm7, %v105_v43  }
  0x8e   :  { %v128_v44 = vpop.permute.xlu1 %127   ;;  %v122_v45 = vpop.permute.xlu0 %121  }
  0x8f   :  { %161 = vst.msk [vmem:[%s315_s1 + $0x8] sm:$0xf] %vm123_vm8, %v128_v44   ;;  %124 = vst.msk [vmem:[%s315_s1] sm:$0xff] %vm123_vm8, %v122_v45  }

// kernel: yolo_loss.5
= control target key start
LH: loop header
LB: loop body
LE: loop exit
PB: predicated region body
PF: predicated region fallthrough
CT: control target
= control target key end

     0   :  { %s63_s0 = inlined_call_operand.vmem [shape: f32[8,128], index: 0, kind: input, shape index: {}]   ;;  %s64_s1 = inlined_call_operand.vmem [shape: f32[8,128], index: 1, kind: input, shape index: {}]   ;;  %s65_s2 = inlined_call_operand.vmem [shape: f32[8,128], index: 2, kind: output, shape index: {}]  }
   0x1   :  { %v11_v0 = vld [vmem:[%s63_s0] sm:$0xff] }
   0x2   :  { %v16_v1 = vand.u32 2147483647, %v11_v0  ;;  %v12_v7 = vld [vmem:[%s64_s1] sm:$0xff]  ;;  %v13_v9 = vmax.f32 %v11_v0, 0.0 }
   0x3   :  { %v14_v10 = vmul.f32 %v12_v7, %v11_v0 }
   0x4   :  { %v17_v2 = vsub.f32 0.0, %v16_v1 }
   0x5   :  { %v15_v14 = vsub.f32 %v13_v9, %v14_v10 }
   0x6   :  { %v18_v3 = vmul.f32 1.442695, %v17_v2 }
   0x8   :  { %35 = vpow2.f32 %v18_v3 }
  0x15   :  { %v36_v4 = vpop.eup %35 }
  0x16   :  { %v20_v5 = vadd.f32 1.0, %v36_v4  ;;  %v23_v6 = vmul.f32 -0.5, %v36_v4  ;;  %v26_v11 = vand.u32 2147483647, %v36_v4 }
  0x18   :  { %37 = vlog2.f32 %v20_v5  ;;  %v24_v8 = vadd.f32 1.0, %v23_v6  ;;  %vm27_vm0 = vcmp.lt.f32.partialorder %v26_v11, 0.0004427343 }
  0x1a   :  { %v25_v12 = vmul.f32 %v36_v4, %v24_v8 }
  0x25   :  { %v38_v13 = vpop.eup %37 }
  0x26   :  { %v22_v15 = vmul.f32 0.6931472, %v38_v13 }
  0x28   :  { %v28_v16 = vsel %vm27_vm0, %v25_v12, %v22_v15 }
  0x29   :  { %v29_v17 = vadd.f32 %v28_v16, %v15_v14 }
  0x2b   :  { %30 = vst [vmem:[%s65_s2] sm:$0xff] %v29_v17 }

// kernel: yolo_loss.3
= control target key start
LH: loop header
LB: loop body
LE: loop exit
PB: predicated region body
PF: predicated region fallthrough
CT: control target
= control target key end

     0   :  { %s93_s0 = inlined_call_operand.vmem [shape: f32[16,128], index: 0, kind: input, shape index: {}]   ;;  %s94_s1 = inlined_call_operand.vmem [shape: f32[16,128], index: 1, kind: input, shape index: {}]   ;;  %s95_s2 = inlined_call_operand.vmem [shape: f32[8,128], index: 2, kind: output, shape index: {}]  }
   0x1   :  { %v11_v0 = vld [vmem:[%s93_s0] sm:$0xff]  ;;  %v12_v1 = vld [vmem:[%s93_s0 + $0x8] sm:$0xff] }
   0x2   :  { %v21_v2 = vand.u32 2147483647, %v11_v0  ;;  %v22_v3 = vand.u32 2147483647, %v12_v1  ;;  %v13_v14 = vld [vmem:[%s94_s1] sm:$0xff]  ;;  %v14_v15 = vld [vmem:[%s94_s1 + $0x8] sm:$0xff] }
   0x3   :  { %v15_v17 = vmax.f32 %v11_v0, 0.0  ;;  %v17_v18 = vmul.f32 %v13_v14, %v11_v0  ;;  %v16_v21 = vmax.f32 %v12_v1, 0.0  ;;  %v18_v22 = vmul.f32 %v14_v15, %v12_v1 }
   0x4   :  { %v23_v4 = vsub.f32 0.0, %v21_v2  ;;  %v24_v5 = vsub.f32 0.0, %v22_v3 }
   0x5   :  { %v19_v26 = vsub.f32 %v15_v17, %v17_v18  ;;  %v20_v29 = vsub.f32 %v16_v21, %v18_v22 }
   0x6   :  { %v25_v6 = vmul.f32 1.442695, %v23_v4  ;;  %v27_v7 = vmul.f32 1.442695, %v24_v5 }
   0x8   :  { %55 = vpow2.f32 %v25_v6 }
   0x9   :  { %57 = vpow2.f32 %v27_v7 }
  0x15   :  { %v56_v8 = vpop.eup %55 }
  0x16   :  { %v58_v9 = vpop.eup %57  ;;  %v29_v10 = vadd.f32 1.0, %v56_v8  ;;  %v32_v12 = vmul.f32 -0.5, %v56_v8  ;;  %v35_v19 = vand.u32 2147483647, %v56_v8 }
  0x17   :  { %v38_v11 = vadd.f32 1.0, %v58_v9  ;;  %v41_v13 = vmul.f32 -0.5, %v58_v9  ;;  %v44_v23 = vand.u32 2147483647, %v58_v9 }
  0x18   :  { %59 = vlog2.f32 %v29_v10  ;;  %v33_v16 = vadd.f32 1.0, %v32_v12  ;;  %vm36_vm0 = vcmp.lt.f32.partialorder %v35_v19, 0.0004427343 }
  0x19   :  { %61 = vlog2.f32 %v38_v11  ;;  %v42_v20 = vadd.f32 1.0, %v41_v13  ;;  %vm45_vm1 = vcmp.lt.f32.partialorder %v44_v23, 0.0004427343 }
  0x1a   :  { %v34_v24 = vmul.f32 %v56_v8, %v33_v16 }
  0x1b   :  { %v43_v27 = vmul.f32 %v58_v9, %v42_v20 }
  0x25   :  { %v60_v25 = vpop.eup %59 }
  0x26   :  { %v62_v28 = vpop.eup %61  ;;  %v31_v30 = vmul.f32 0.6931472, %v60_v25 }
  0x27   :  { %v40_v31 = vmul.f32 0.6931472, %v62_v28 }
  0x28   :  { %v37_v32 = vsel %vm36_vm0, %v34_v24, %v31_v30 }
  0x29   :  { %v46_v33 = vsel %vm45_vm1, %v43_v27, %v40_v31  ;;  %v47_v34 = vadd.f32 %v37_v32, %v19_v26 }
  0x2a   :  { %v48_v35 = vadd.f32 %v46_v33, %v20_v29 }
  0x2c   :  { %v49_v36 = vadd.f32 %v48_v35, %v47_v34 }
  0x2e   :  { %50 = vst [vmem:[%s95_s2] sm:$0xff] %v49_v36 }

</bundles_post_ra>
